<compile_context>
chip_gen: v7x
topology: tpu7x:2x2x1
jax: 0.10.0
libtpu: 0.0.40
codegen_flags: <defaults>
</compile_context>

<pallas_src>
import functools

import jax
import jax.numpy as jnp
from jax.experimental import pallas as pl
from jax.experimental.pallas import tpu as pltpu


def _round_up(x, m):
    return (x + m - 1) // m * m


@functools.lru_cache(maxsize=None)
def _vmem_limit_bytes():
    # Size the scoped-VMEM limit off the real chip (v7x has 64 MiB, not 128).
    try:
        cap = int(pltpu.get_tpu_info().vmem_capacity_bytes)
    except Exception:
        cap = 64 * 1024 * 1024
    return int(max(32 * 1024 * 1024,
                   min(cap - 32 * 1024 * 1024, 96 * 1024 * 1024)))


def _conv_stats_kernel(x_ref, w_ref, stats_ref, *, K, L_out, L_out_pad):
    # x_ref:     (1, L_pad, Cin)  bf16, one batch element (L_pad = L_out_pad + K - 1)
    # w_ref:     (K, Cin, TC)     bf16, VMEM-resident weight slab
    # stats_ref: (8, TC)          f32, resident accumulator (row0 = sum, row1 = sum sq)
    i = pl.program_id(1)                       # batch index (trailing "arbitrary" axis)

    @pl.when(i == 0)
    def _():
        stats_ref[...] = jnp.zeros_like(stats_ref)

    x = x_ref[0]                               # (L_pad, Cin)
    tc = w_ref.shape[2]
    acc = jnp.zeros((L_out_pad, tc), jnp.float32)
    for k in range(K):                         # static unroll: in-kernel im2col
        acc = acc + jnp.dot(x[k:k + L_out_pad, :], w_ref[k],
                            preferred_element_type=jnp.float32)

    if L_out_pad != L_out:                     # padded output rows must not pollute stats
        row = jax.lax.broadcasted_iota(jnp.int32, (L_out_pad, 1), 0)
        acc = jnp.where(row < L_out, acc, 0.0)

    # Single full-tile accumulator update (unmasked vst, no sub-sublane RMW).
    s = jnp.broadcast_to(jnp.sum(acc, axis=0, keepdims=True), (8, tc))
    ss = jnp.broadcast_to(jnp.sum(acc * acc, axis=0, keepdims=True), (8, tc))
    srow = jax.lax.broadcasted_iota(jnp.int32, (8, tc), 0)
    upd = jnp.where(srow == 0, s, jnp.where(srow == 1, ss, 0.0))
    stats_ref[...] = stats_ref[...] + upd


def _conv_bn_relu_kernel(x_ref, w_ref, scale_ref, shift_ref, o_ref, *, K, L_out_pad):
    # Recompute the conv tile (cheaper than writing/re-reading an f32 y) and fuse BN+ReLU.
    x = x_ref[0]                               # (L_pad, Cin) bf16
    tc = w_ref.shape[2]
    acc = jnp.zeros((L_out_pad, tc), jnp.float32)
    for k in range(K):
        acc = acc + jnp.dot(x[k:k + L_out_pad, :], w_ref[k],
                            preferred_element_type=jnp.float32)
    o_ref[0] = jnp.maximum(acc * scale_ref[...] + shift_ref[...], 0.0)


@jax.jit
def conv1d_bn_relu(x, w, gamma, beta):
    """x: (N, Cin, L), w: (Cout, Cin, K), gamma/beta: (Cout,).
    Returns (N, Cout, L-K+1) f32 == Conv1d(bias=False) -> BatchNorm1d (train-mode
    batch stats, biased var, eps=1e-5) -> ReLU.  The conv uses bf16 MXU inputs
    with f32 accumulation (deliberate quantization); BN math is f32."""
    N, Cin, L = x.shape
    Cout, _, K = w.shape
    L_out = L - K + 1
    eps = 1e-5

    L_out_pad = _round_up(L_out, 8)
    L_pad = L_out_pad + K - 1
    # Channel padding: 128 minimum; 256-wide tiles when Cout > 128 (2x256^2 MXU).
    Cp = 128 if Cout <= 128 else _round_up(Cout, 256)
    TC = min(Cp, 256)
    n_ct = Cp // TC

    # Activations: (N, L_pad, Cin) bf16; padded tail rows are zero.
    x_nlc = jnp.transpose(x, (0, 2, 1)).astype(jnp.bfloat16)
    x_nlc = jnp.pad(x_nlc, ((0, 0), (0, L_pad - L), (0, 0)))

    # Weights: (K, Cin, Cp) bf16 so that y[l, co] = sum_k x[l+k, :] @ w[k, :, co].
    w_kic = jnp.transpose(w, (2, 1, 0)).astype(jnp.bfloat16)
    w_kic = jnp.pad(w_kic, ((0, 0), (0, 0), (0, Cp - Cout)))

    vmem_limit = _vmem_limit_bytes()
    flops = 2 * N * L_out_pad * Cin * K * Cp
    bytes_x = 2 * N * L_pad * Cin * n_ct
    bytes_w = 2 * K * Cin * Cp

    # Pass 1: per-channel sum / sum-of-squares of the conv output (no y in HBM).
    stats = pl.pallas_call(
        functools.partial(_conv_stats_kernel, K=K, L_out=L_out, L_out_pad=L_out_pad),
        grid=(n_ct, N),
        in_specs=[
            pl.BlockSpec((1, L_pad, Cin), lambda j, i: (i, 0, 0)),
            pl.BlockSpec((K, Cin, TC), lambda j, i: (0, 0, j)),    # resident weights
        ],
        out_specs=pl.BlockSpec((8, TC), lambda j, i: (0, j)),      # resident accumulator
        out_shape=jax.ShapeDtypeStruct((8, Cp), jnp.float32),
        compiler_params=pltpu.CompilerParams(
            dimension_semantics=("parallel", "arbitrary"),
            vmem_limit_bytes=vmem_limit,
        ),
        cost_estimate=pl.CostEstimate(
            flops=flops, transcendentals=0,
            bytes_accessed=bytes_x + bytes_w + 4 * 8 * Cp),
    )(x_nlc, w_kic)

    # Fold train-mode BN (biased variance) into a per-channel scale/shift.  Padded
    # channels have zero weights and gamma=beta=0, so they yield exact zeros.
    # TODO(synk): running_mean/running_var momentum buffers are not updated (pure forward).
    count = jnp.float32(N * L_out)
    mean = stats[0] / count
    var = jnp.maximum(stats[1] / count - mean * mean, 0.0)
    g = jnp.pad(gamma.astype(jnp.float32), (0, Cp - Cout))
    b = jnp.pad(beta.astype(jnp.float32), (0, Cp - Cout))
    scale_v = g * jax.lax.rsqrt(var + eps)
    shift_v = b - mean * scale_v
    scale = scale_v.reshape(1, Cp)
    shift = shift_v.reshape(1, Cp)

    # Pass 2: recompute conv tile, fused scale/shift + ReLU, lane-dense f32 output.
    out_pad = pl.pallas_call(
        functools.partial(_conv_bn_relu_kernel, K=K, L_out_pad=L_out_pad),
        grid=(N, n_ct),
        in_specs=[
            pl.BlockSpec((1, L_pad, Cin), lambda n, j: (n, 0, 0)),
            pl.BlockSpec((K, Cin, TC), lambda n, j: (0, 0, j)),
            pl.BlockSpec((1, TC), lambda n, j: (0, j)),
            pl.BlockSpec((1, TC), lambda n, j: (0, j)),
        ],
        out_specs=pl.BlockSpec((1, L_out_pad, TC), lambda n, j: (n, 0, j)),
        out_shape=jax.ShapeDtypeStruct((N, L_out_pad, Cp), jnp.float32),
        compiler_params=pltpu.CompilerParams(
            dimension_semantics=("parallel", "parallel"),
            vmem_limit_bytes=vmem_limit,
        ),
        cost_estimate=pl.CostEstimate(
            flops=flops, transcendentals=0,
            bytes_accessed=bytes_x + bytes_w + 4 * N * L_out_pad * Cp),
    )(x_nlc, w_kic, scale, shift)

    out = out_pad[:, :L_out, :Cout]            # (N, L_out, Cout)
    return jnp.transpose(out, (0, 2, 1))       # (N, Cout, L_out)


def _reference(x, w, gamma, beta, eps=1e-5):
    # Same semantics as the PyTorch module (train-mode BN, biased variance), with
    # the conv performed at the kernel's bf16-input / f32-accumulation precision.
    y = jax.lax.conv_general_dilated(
        x.astype(jnp.bfloat16), w.astype(jnp.bfloat16),
        window_strides=(1,), padding="VALID",
        dimension_numbers=("NCH", "OIH", "NCH"),
        preferred_element_type=jnp.float32)
    mean = jnp.mean(y, axis=(0, 2), keepdims=True)
    var = jnp.mean((y - mean) ** 2, axis=(0, 2), keepdims=True)
    y = (y - mean) * jax.lax.rsqrt(var + eps)
    y = y * gamma[None, :, None] + beta[None, :, None]
    return jnp.maximum(y, 0.0)


if __name__ == "__main__":
    key = jax.random.PRNGKey(0)
    k_x, k_w, k_g, k_b = jax.random.split(key, 4)

    # Small shapes consistent with Conv1d: N=2, in_channel=4, L=16, out_channel=8, ksize=3
    N, Cin, L, Cout, K = 2, 4, 16, 8, 3
    x = jax.random.normal(k_x, (N, Cin, L), dtype=jnp.float32)
    w = jax.random.normal(k_w, (Cout, Cin, K), dtype=jnp.float32) * 0.1
    gamma = jax.random.normal(k_g, (Cout,), dtype=jnp.float32) * 0.5 + 1.0
    beta = jax.random.normal(k_b, (Cout,), dtype=jnp.float32) * 0.1

    out = conv1d_bn_relu(x, w, gamma, beta)
    out = jax.block_until_ready(out)

    ref = _reference(x, w, gamma, beta)
    assert out.shape == (N, Cout, L - K + 1)
    err = float(jnp.max(jnp.abs(out - ref)))
    assert jnp.allclose(out, ref, atol=2e-3, rtol=2e-3), err

    print("KERNEL_OK")
</pallas_src>

<mosaic_0001>
module attributes {stable_mosaic.version = 11 : i64} {
  func.func @_conv_stats_kernel(%arg0: i32, %arg1: i32, %arg2: memref<1x18x4xbf16, #tpu.memory_space<vmem>>, %arg3: memref<3x4x128xbf16, #tpu.memory_space<vmem>>, %arg4: memref<8x128xf32, #tpu.memory_space<vmem>>) attributes {dimension_semantics = [#tpu.dimension_semantics<parallel>, #tpu.dimension_semantics<arbitrary>], iteration_bounds = array<i64: 1, 2>, scalar_prefetch = 0 : i64, scratch_operands = 0 : i64, tpu.core_type = #tpu.core_type<tc>, window_params = [{transform_indices = @transform_0, window_bounds = array<i64: 1, 18, 4>}, {transform_indices = @transform_1, window_bounds = array<i64: 3, 4, 128>}, {transform_indices = @transform_2, window_bounds = array<i64: 8, 128>}]} {
    %c0_i32 = arith.constant 0 : i32
    %0 = arith.cmpi eq, %arg1, %c0_i32 : i32
    %1 = arith.extui %0 : i1 to i32
    %c0_i32_0 = arith.constant 0 : i32
    %2 = arith.cmpi ne, %1, %c0_i32_0 : i32
    scf.if %2 {
      %cst_22 = arith.constant 0.000000e+00 : f32
      %48 = vector.broadcast %cst_22 : f32 to vector<8x128xf32>
      %c0_23 = arith.constant 0 : index
      %c0_24 = arith.constant 0 : index
      %49 = vector.load %arg4[%c0_23, %c0_24] : memref<8x128xf32, #tpu.memory_space<vmem>>, vector<8x128xf32>
      tpu.vector_store %arg4[%c0_23, %c0_24], %48 {strides = array<i32>} : memref<8x128xf32, #tpu.memory_space<vmem>>, vector<8x128xf32>,
    } else {
    }
    %c0 = arith.constant 0 : index
    %c0_1 = arith.constant 0 : index
    %c0_2 = arith.constant 0 : index
    %3 = vector.load %arg2[%c0, %c0_1, %c0_2] : memref<1x18x4xbf16, #tpu.memory_space<vmem>>, vector<1x18x4xbf16>
    %4 = vector.shape_cast %3 : vector<1x18x4xbf16> to vector<18x4xbf16>
    %cst = arith.constant 0.000000e+00 : f32
    %5 = vector.broadcast %cst : f32 to vector<16x128xf32>
    %6 = vector.extract_strided_slice %4 {offsets = [0, 0], sizes = [16, 4], strides = [1, 1]} : vector<18x4xbf16> to vector<16x4xbf16>
    %c0_3 = arith.constant 0 : index
    %c0_4 = arith.constant 0 : index
    %c0_5 = arith.constant 0 : index
    %7 = vector.load %arg3[%c0_3, %c0_4, %c0_5] : memref<3x4x128xbf16, #tpu.memory_space<vmem>>, vector<1x4x128xbf16>
    %8 = vector.shape_cast %7 : vector<1x4x128xbf16> to vector<4x128xbf16>
    %cst_6 = arith.constant dense<0.000000e+00> : vector<16x128xf32>
    %9 = tpu.matmul %6, %8, %cst_6 {dimension_numbers = #tpu.dot_dimension_numbers<[1], [0], [0], [1], [0, 0, 1, 1], [], []>} : vector<16x4xbf16>, vector<4x128xbf16>, vector<16x128xf32> -> vector<16x128xf32>
    %10 = arith.addf %5, %9 : vector<16x128xf32>
    %11 = vector.extract_strided_slice %4 {offsets = [1, 0], sizes = [16, 4], strides = [1, 1]} : vector<18x4xbf16> to vector<16x4xbf16>
    %c1 = arith.constant 1 : index
    %c0_7 = arith.constant 0 : index
    %c0_8 = arith.constant 0 : index
    %12 = vector.load %arg3[%c1, %c0_7, %c0_8] : memref<3x4x128xbf16, #tpu.memory_space<vmem>>, vector<1x4x128xbf16>
    %13 = vector.shape_cast %12 : vector<1x4x128xbf16> to vector<4x128xbf16>
    %cst_9 = arith.constant dense<0.000000e+00> : vector<16x128xf32>
    %14 = tpu.matmul %11, %13, %cst_9 {dimension_numbers = #tpu.dot_dimension_numbers<[1], [0], [0], [1], [0, 0, 1, 1], [], []>} : vector<16x4xbf16>, vector<4x128xbf16>, vector<16x128xf32> -> vector<16x128xf32>
    %15 = arith.addf %10, %14 : vector<16x128xf32>
    %16 = vector.extract_strided_slice %4 {offsets = [2, 0], sizes = [16, 4], strides = [1, 1]} : vector<18x4xbf16> to vector<16x4xbf16>
    %c2 = arith.constant 2 : index
    %c0_10 = arith.constant 0 : index
    %c0_11 = arith.constant 0 : index
    %17 = vector.load %arg3[%c2, %c0_10, %c0_11] : memref<3x4x128xbf16, #tpu.memory_space<vmem>>, vector<1x4x128xbf16>
    %18 = vector.shape_cast %17 : vector<1x4x128xbf16> to vector<4x128xbf16>
    %cst_12 = arith.constant dense<0.000000e+00> : vector<16x128xf32>
    %19 = tpu.matmul %16, %18, %cst_12 {dimension_numbers = #tpu.dot_dimension_numbers<[1], [0], [0], [1], [0, 0, 1, 1], [], []>} : vector<16x4xbf16>, vector<4x128xbf16>, vector<16x128xf32> -> vector<16x128xf32>
    %20 = arith.addf %15, %19 : vector<16x128xf32>
    %21 = tpu.iota {dimensions = array<i32: 0>} : vector<16x1xi32>
    %c14_i32 = arith.constant 14 : i32
    %22 = vector.broadcast %c14_i32 : i32 to vector<16x1xi32>
    %23 = arith.cmpi slt, %21, %22 : vector<16x1xi32>
    %cst_13 = arith.constant 0.000000e+00 : f32
    %24 = vector.shape_cast %23 : vector<16x1xi1> to vector<16x1xi1>
    %25 = vector.broadcast %24 : vector<16x1xi1> to vector<16x128xi1>
    %26 = vector.broadcast %cst_13 : f32 to vector<16x128xf32>
    %27 = arith.select %25, %20, %26 : vector<16x128xi1>, vector<16x128xf32>
    %cst_14 = arith.constant dense<0.000000e+00> : vector<128xf32>
    %28 = vector.multi_reduction <add>, %27, %cst_14 [0] : vector<16x128xf32> to vector<128xf32>
    %29 = vector.shape_cast %28 : vector<128xf32> to vector<1x128xf32>
    %30 = vector.shape_cast %29 : vector<1x128xf32> to vector<1x128xf32>
    %31 = vector.broadcast %30 : vector<1x128xf32> to vector<8x128xf32>
    %32 = arith.mulf %27, %27 : vector<16x128xf32>
    %cst_15 = arith.constant dense<0.000000e+00> : vector<128xf32>
    %33 = vector.multi_reduction <add>, %32, %cst_15 [0] : vector<16x128xf32> to vector<128xf32>
    %34 = vector.shape_cast %33 : vector<128xf32> to vector<1x128xf32>
    %35 = vector.shape_cast %34 : vector<1x128xf32> to vector<1x128xf32>
    %36 = vector.broadcast %35 : vector<1x128xf32> to vector<8x128xf32>
    %37 = tpu.iota {dimensions = array<i32: 0>} : vector<8x128xi32>
    %c0_i32_16 = arith.constant 0 : i32
    %38 = vector.broadcast %c0_i32_16 : i32 to vector<8x128xi32>
    %39 = arith.cmpi eq, %37, %38 : vector<8x128xi32>
    %c1_i32 = arith.constant 1 : i32
    %40 = vector.broadcast %c1_i32 : i32 to vector<8x128xi32>
    %41 = arith.cmpi eq, %37, %40 : vector<8x128xi32>
    %cst_17 = arith.constant 0.000000e+00 : f32
    %42 = vector.broadcast %cst_17 : f32 to vector<8x128xf32>
    %43 = arith.select %41, %36, %42 : vector<8x128xi1>, vector<8x128xf32>
    %44 = arith.select %39, %31, %43 : vector<8x128xi1>, vector<8x128xf32>
    %c0_18 = arith.constant 0 : index
    %c0_19 = arith.constant 0 : index
    %45 = vector.load %arg4[%c0_18, %c0_19] : memref<8x128xf32, #tpu.memory_space<vmem>>, vector<8x128xf32>
    %46 = arith.addf %45, %44 : vector<8x128xf32>
    %c0_20 = arith.constant 0 : index
    %c0_21 = arith.constant 0 : index
    %47 = vector.load %arg4[%c0_20, %c0_21] : memref<8x128xf32, #tpu.memory_space<vmem>>, vector<8x128xf32>
    tpu.vector_store %arg4[%c0_20, %c0_21], %46 {strides = array<i32>} : memref<8x128xf32, #tpu.memory_space<vmem>>, vector<8x128xf32>,
    return
  }
  func.func @transform_0(%arg0: i32, %arg1: i32) -> (i32, i32, i32) {
    %c0_i32 = arith.constant 0 : i32
    %c0_i32_0 = arith.constant 0 : i32
    %c0_i32_1 = arith.constant 0 : i32
    return %arg1, %c0_i32, %c0_i32_0 : i32, i32, i32
  }
  func.func @transform_1(%arg0: i32, %arg1: i32) -> (i32, i32, i32) {
    %c0_i32 = arith.constant 0 : i32
    %c0_i32_0 = arith.constant 0 : i32
    %c0_i32_1 = arith.constant 0 : i32
    return %c0_i32, %c0_i32_0, %arg0 : i32, i32, i32
  }
  func.func @transform_2(%arg0: i32, %arg1: i32) -> (i32, i32) {
    %c0_i32 = arith.constant 0 : i32
    %c0_i32_0 = arith.constant 0 : i32
    return %c0_i32, %arg0 : i32, i32
  }
}

module attributes {stable_mosaic.version = 11 : i64} {
  func.func @_conv_bn_relu_kernel(%arg0: i32, %arg1: i32, %arg2: memref<1x18x4xbf16, #tpu.memory_space<vmem>>, %arg3: memref<3x4x128xbf16, #tpu.memory_space<vmem>>, %arg4: memref<1x128xf32, #tpu.memory_space<vmem>>, %arg5: memref<1x128xf32, #tpu.memory_space<vmem>>, %arg6: memref<1x16x128xf32, #tpu.memory_space<vmem>>) attributes {dimension_semantics = [#tpu.dimension_semantics<parallel>, #tpu.dimension_semantics<parallel>], iteration_bounds = array<i64: 2, 1>, scalar_prefetch = 0 : i64, scratch_operands = 0 : i64, tpu.core_type = #tpu.core_type<tc>, window_params = [{transform_indices = @transform_0, window_bounds = array<i64: 1, 18, 4>}, {transform_indices = @transform_1, window_bounds = array<i64: 3, 4, 128>}, {transform_indices = @transform_2, window_bounds = array<i64: 1, 128>}, {transform_indices = @transform_3, window_bounds = array<i64: 1, 128>}, {transform_indices = @transform_4, window_bounds = array<i64: 1, 16, 128>}]} {
    %c0 = arith.constant 0 : index
    %c0_0 = arith.constant 0 : index
    %c0_1 = arith.constant 0 : index
    %0 = vector.load %arg2[%c0, %c0_0, %c0_1] : memref<1x18x4xbf16, #tpu.memory_space<vmem>>, vector<1x18x4xbf16>
    %1 = vector.shape_cast %0 : vector<1x18x4xbf16> to vector<18x4xbf16>
    %cst = arith.constant 0.000000e+00 : f32
    %2 = vector.broadcast %cst : f32 to vector<16x128xf32>
    %3 = vector.extract_strided_slice %1 {offsets = [0, 0], sizes = [16, 4], strides = [1, 1]} : vector<18x4xbf16> to vector<16x4xbf16>
    %c0_2 = arith.constant 0 : index
    %c0_3 = arith.constant 0 : index
    %c0_4 = arith.constant 0 : index
    %4 = vector.load %arg3[%c0_2, %c0_3, %c0_4] : memref<3x4x128xbf16, #tpu.memory_space<vmem>>, vector<1x4x128xbf16>
    %5 = vector.shape_cast %4 : vector<1x4x128xbf16> to vector<4x128xbf16>
    %cst_5 = arith.constant dense<0.000000e+00> : vector<16x128xf32>
    %6 = tpu.matmul %3, %5, %cst_5 {dimension_numbers = #tpu.dot_dimension_numbers<[1], [0], [0], [1], [0, 0, 1, 1], [], []>} : vector<16x4xbf16>, vector<4x128xbf16>, vector<16x128xf32> -> vector<16x128xf32>
    %7 = arith.addf %2, %6 : vector<16x128xf32>
    %8 = vector.extract_strided_slice %1 {offsets = [1, 0], sizes = [16, 4], strides = [1, 1]} : vector<18x4xbf16> to vector<16x4xbf16>
    %c1 = arith.constant 1 : index
    %c0_6 = arith.constant 0 : index
    %c0_7 = arith.constant 0 : index
    %9 = vector.load %arg3[%c1, %c0_6, %c0_7] : memref<3x4x128xbf16, #tpu.memory_space<vmem>>, vector<1x4x128xbf16>
    %10 = vector.shape_cast %9 : vector<1x4x128xbf16> to vector<4x128xbf16>
    %cst_8 = arith.constant dense<0.000000e+00> : vector<16x128xf32>
    %11 = tpu.matmul %8, %10, %cst_8 {dimension_numbers = #tpu.dot_dimension_numbers<[1], [0], [0], [1], [0, 0, 1, 1], [], []>} : vector<16x4xbf16>, vector<4x128xbf16>, vector<16x128xf32> -> vector<16x128xf32>
    %12 = arith.addf %7, %11 : vector<16x128xf32>
    %13 = vector.extract_strided_slice %1 {offsets = [2, 0], sizes = [16, 4], strides = [1, 1]} : vector<18x4xbf16> to vector<16x4xbf16>
    %c2 = arith.constant 2 : index
    %c0_9 = arith.constant 0 : index
    %c0_10 = arith.constant 0 : index
    %14 = vector.load %arg3[%c2, %c0_9, %c0_10] : memref<3x4x128xbf16, #tpu.memory_space<vmem>>, vector<1x4x128xbf16>
    %15 = vector.shape_cast %14 : vector<1x4x128xbf16> to vector<4x128xbf16>
    %cst_11 = arith.constant dense<0.000000e+00> : vector<16x128xf32>
    %16 = tpu.matmul %13, %15, %cst_11 {dimension_numbers = #tpu.dot_dimension_numbers<[1], [0], [0], [1], [0, 0, 1, 1], [], []>} : vector<16x4xbf16>, vector<4x128xbf16>, vector<16x128xf32> -> vector<16x128xf32>
    %17 = arith.addf %12, %16 : vector<16x128xf32>
    %c0_12 = arith.constant 0 : index
    %c0_13 = arith.constant 0 : index
    %18 = vector.load %arg4[%c0_12, %c0_13] : memref<1x128xf32, #tpu.memory_space<vmem>>, vector<1x128xf32>
    %19 = vector.broadcast %18 : vector<1x128xf32> to vector<16x128xf32>
    %20 = arith.mulf %17, %19 : vector<16x128xf32>
    %c0_14 = arith.constant 0 : index
    %c0_15 = arith.constant 0 : index
    %21 = vector.load %arg5[%c0_14, %c0_15] : memref<1x128xf32, #tpu.memory_space<vmem>>, vector<1x128xf32>
    %22 = vector.broadcast %21 : vector<1x128xf32> to vector<16x128xf32>
    %23 = arith.addf %20, %22 : vector<16x128xf32>
    %cst_16 = arith.constant 0.000000e+00 : f32
    %24 = vector.broadcast %cst_16 : f32 to vector<16x128xf32>
    %25 = arith.maximumf %23, %24 : vector<16x128xf32>
    %c0_17 = arith.constant 0 : index
    %c0_18 = arith.constant 0 : index
    %c0_19 = arith.constant 0 : index
    %26 = vector.load %arg6[%c0_17, %c0_18, %c0_19] : memref<1x16x128xf32, #tpu.memory_space<vmem>>, vector<1x16x128xf32>
    %27 = vector.shape_cast %26 : vector<1x16x128xf32> to vector<16x128xf32>
    %28 = vector.shape_cast %25 : vector<16x128xf32> to vector<1x16x128xf32>
    tpu.vector_store %arg6[%c0_17, %c0_18, %c0_19], %28 {strides = array<i32>} : memref<1x16x128xf32, #tpu.memory_space<vmem>>, vector<1x16x128xf32>,
    return
  }
  func.func @transform_0(%arg0: i32, %arg1: i32) -> (i32, i32, i32) {
    %c0_i32 = arith.constant 0 : i32
    %c0_i32_0 = arith.constant 0 : i32
    %c0_i32_1 = arith.constant 0 : i32
    return %arg0, %c0_i32, %c0_i32_0 : i32, i32, i32
  }
  func.func @transform_1(%arg0: i32, %arg1: i32) -> (i32, i32, i32) {
    %c0_i32 = arith.constant 0 : i32
    %c0_i32_0 = arith.constant 0 : i32
    %c0_i32_1 = arith.constant 0 : i32
    return %c0_i32, %c0_i32_0, %arg1 : i32, i32, i32
  }
  func.func @transform_2(%arg0: i32, %arg1: i32) -> (i32, i32) {
    %c0_i32 = arith.constant 0 : i32
    %c0_i32_0 = arith.constant 0 : i32
    return %c0_i32, %arg1 : i32, i32
  }
  func.func @transform_3(%arg0: i32, %arg1: i32) -> (i32, i32) {
    %c0_i32 = arith.constant 0 : i32
    %c0_i32_0 = arith.constant 0 : i32
    return %c0_i32, %arg1 : i32, i32
  }
  func.func @transform_4(%arg0: i32, %arg1: i32) -> (i32, i32, i32) {
    %c0_i32 = arith.constant 0 : i32
    %c0_i32_0 = arith.constant 0 : i32
    return %arg0, %c0_i32, %arg1 : i32, i32, i32
  }
}

</mosaic_0001>

<bundles_post_ra>
// kernel: conv1d_bn_relu.2
= control target key start
LH: loop header
LB: loop body
LE: loop exit
PB: predicated region body
PF: predicated region fallthrough
CT: control target
= control target key end

     0   :  { %s581_s9 = smov 0   ;;  %s583_s10 = smov 0   ;;  %s635_s0 = inlined_call_operand.vmem [shape: bf16[2,18,4], index: 0, kind: input, shape index: {}]   ;;  %s636_s1 = inlined_call_operand.vmem [shape: bf16[3,4,128], index: 1, kind: input, shape index: {}]   ;;  %s637_s2 = inlined_call_operand.vmem [shape: f32[8,128], index: 2, kind: output, shape index: {}]  }
   0x1   :  { %s585_s11 = smov 0  }
   0x2 LB: > { %s21_s12 = sadd.s32 1, %s557_s10  ;;  %p466_p0 = scmp.ge.s32.totalorder %s561_s11, 1  ;;  %s561_s11 = sphi %s585_s11, %s12_s11   ;;  %s557_s10 = sphi %s583_s10, %s639_s10   ;;  %s553_s9 = sphi %s581_s9, %s638_s9  }
   0x3   : > { %p22_p1 = scmp.ge.s32.totalorder %s21_s12, 2  ;;  %p133_p2 = scmp.lt.s32.totalorder %s561_s11, 3 }
   0x5   : > { %s641_s12 = smov (%p22_p1, %s21_s12), 0  ;;  %p134_p3 = pnand %p466_p0, %p133_p2 }
   0x6   : > { %p158_p4 = scmp.lt.s32.totalorder (!%p134_p3), %s553_s9, 1  ;;  %p468_p5 = scmp.ne.s32.totalorder (!%p134_p3), %s553_s9, 0 }
   0x7   : > { %137 = sbr.rel (%p134_p3) target bundleno = 277 (0x115), region = 28 }
   0xe   : > { %s159_s13 = scalar_select %p158_p4, %s553_s9, 1 }
   0xf   : > { %175 = sbr.rel (%p468_p5) target bundleno = 22 (0x16), region = 32  ;;  %v563_v0 = vmov (!%p468_p5), 0.0  }
  0x10   : > { %s509_s14 = smul.u32 12, %s159_s13  ;;  %176 = vst [vmem:[%s637_s2] sm:$0xff] (!%p468_p5), %v563_v0 }
  0x12   : > { %s162_s17 = scalar_lea.vmem %s635_s0, %s509_s14 }
  0x16 PF: > { %v180_v1 = vld [vmem:[%s636_s1] sm:$0x3]  ;;  %vm208_vm0 = vcmask 1041408   ;;  %v564_v3 = vmov 0.0   ;;  %vm565_vm1 = vmmov 0   ;;  %vm204_vm2 = vcmask 31744  }
  0x17   : > { %v537_v2 = vld [vmem:[%s162_s17] sm:$0xff]   ;;  %491 = vmatprep.subr.bf16.mxu0 %v564_v3  ;;  %v256_v4 = vsel %vm208_vm0, %v180_v1, 0  ;;  %493 = vmatprep.mubr.msk.bf16.mxu0 %vm565_vm1, %v564_v3  ;;  %v538_v9 = vld [vmem:[%s162_s17 + $0x8] ss:$0 sps:$4 sm:$0x11]   ;;  %vm301_vm4 = vcmask 1046528   ;;  %v354_v20 = vlaneseq }
  0x18   : > { %492 = vmatpush3.bf16.msra.mxu0 %v256_v4  ;;  %v474_v5 = vld [vmem:[%s636_s1 + $0x4] sm:$0x3]  ;;  %485 = vmatprep.subr.bf16.mxu1 %v564_v3  ;;  %v469_v6 = vld [vmem:[%s636_s1 + $0x2] sm:$0x3]  ;;  %v193_v10 = vshrl.u32 %v537_v2, 16  ;;  %v195_v11 = vshll.u32 %v537_v2, 16 }
  0x19   : > { %497 = vmatprep.subr.bf16.mxu0 %v564_v3  ;;  %v309_v7 = vsel %vm208_vm0, %v474_v5, 0  ;;  %v210_v8 = vsel %vm208_vm0, %v469_v6, 0  ;;  %487 = vmatprep.mubr.msk.bf16.mxu1 %vm565_vm1, %v564_v3  ;;  %v200_v12 = vshll.u32 %v538_v9, 16  ;;  %vm191_vm3 = vsmask.f32 7424  ;;  %v385_v50 = vld [vmem:[%s637_s2] sm:$0xff] }
  0x1a   : > { %486 = vmatpush3.bf16.msra.mxu1 %v210_v8  ;;  %v197_v13 = vrot.slane %v195_v11, 1  ;;  %v302_v17 = vrot.slane %v537_v2, 1  ;;  %v303_v18 = vrot.slane %v538_v9, 1  ;;  %v355_v22 = vshrl.u32 %v354_v20, 7 }
  0x1b   : > { %494 = vmatmul.mubr.msk.bf16.vlgmr.msra.gmra.mrb[0].mxu0 %vm204_vm2, %v537_v2  ;;  %v202_v14 = vrot.slane %v200_v12, 1 }
  0x1c   : > { %498 = vmatpush3.bf16.msra.mxu0 %v309_v7  ;;  %499 = vmatprep.mubr.msk.bf16.mxu0 %vm565_vm1, %v564_v3  ;;  %v198_v15 = vor.u32 %v197_v13, %v193_v10  ;;  %v304_v19 = vsel %vm301_vm4, %v302_v17, %v303_v18  ;;  %v356_v26 = vadd.s32 8, %v355_v22  ;;  %vm382_vm6 = vcmp.eq.s32.totalorder %v355_v22, 1 }
  0x1d   : > { %vm381_vm7 = vcmp.eq.s32.totalorder %v355_v22, 0 }
  0x1e   : > { %v203_v16 = vsel %vm191_vm3, %v198_v15, %v202_v14  ;;  %vm358_vm5 = vcmp.lt.s32.totalorder %v356_v26, 14 }
  0x1f   : > { %488 = vmatmul.mubr.msk.bf16.vlgmr.msra.gmra.mrb[0].mxu1 %vm204_vm2, %v203_v16 }
  0x27   : > { %500 = vmatmul.mubr.msk.bf16.vlgmr.msra.gmra.mrb[0].mxu0 %vm204_vm2, %v304_v19 }
  0xf2   : > { %v246_v21 = vpop.f32.mrb[0].mxu1 }
  0xf3   : > { %v489_v23 = vpop.f32.mrb[1].mxu1 }
  0xf4   : > { %v249_v24 = vpop.f32.mrb[2].mxu1 }
  0xf5   : > { %v490_v25 = vpop.f32.mrb[3].mxu1 }
  0xfa   : > { %v345_v27 = vpop.f32.mrb[0].mxu0 }
  0xfb   : > { %v503_v28 = vadd.f32 %v345_v27, %v246_v21  ;;  %v501_v29 = vpop.f32.mrb[1].mxu0 }
  0xfc   : > { %v348_v30 = vpop.f32.mrb[2].mxu0 }
  0xfd   : > { %v504_v31 = vadd.f32 %v348_v30, %v249_v24  ;;  %v502_v32 = vpop.f32.mrb[3].mxu0  ;;  %v372_v34 = vmul.f32 %v503_v28, %v503_v28 }
  0xff   : > { %v364_v33 = vsel %vm358_vm5, %v504_v31, 0.0 }
 0x100   : > { %v365_v35 = vadd.f32 %v503_v28, %v364_v33  ;;  %v373_v36 = vmul.f32 %v364_v33, %v364_v33 }
 0x102   : > { %v366_v37 = vrot.slane %v365_v35, 4  ;;  %v374_v38 = vadd.f32 %v373_v36, %v372_v34 }
 0x104   : > { %v367_v39 = vadd.f32 %v366_v37, %v365_v35  ;;  %v375_v40 = vrot.slane %v374_v38, 4 }
 0x106   : > { %v368_v41 = vrot.slane %v367_v39, 2  ;;  %v376_v42 = vadd.f32 %v375_v40, %v374_v38 }
 0x108   : > { %v369_v43 = vadd.f32 %v368_v41, %v367_v39  ;;  %v377_v44 = vrot.slane %v376_v42, 2 }
 0x10a   : > { %v378_v45 = vadd.f32 %v377_v44, %v376_v42  ;;  %v370_v46 = vrot.slane %v369_v43, 1 }
 0x10c   : > { %v379_v47 = vrot.slane %v378_v45, 1  ;;  %v371_v49 = vadd.f32 %v370_v46, %v369_v43 }
 0x10e   : > { %v380_v48 = vadd.f32 %v379_v47, %v378_v45 }
 0x110   : > { %v383_v51 = vsel %vm382_vm6, %v380_v48, 0.0 }
 0x111   : > { %v384_v52 = vsel %vm381_vm7, %v371_v49, %v383_v51 }
 0x112   : > { %v386_v53 = vadd.f32 %v385_v50, %v384_v52 }
 0x114   : > { %387 = vst [vmem:[%s637_s2] sm:$0xff] %v386_v53 }
 0x115 PF: > { %s12_s11 = sadd.s32 1, %s561_s11   ;;  %s638_s9 = smov %s557_s10 }
 0x116   : > { %p9_p6 = scmp.ge.s32.totalorder %s12_s11, 4   ;;  %s639_s10 = smov %s641_s12 }
 0x118   :  { %11 = sbr.rel (!%p9_p6) target bundleno = 2 (0x2), region = 67 }

// kernel: conv1d_bn_relu.3
= control target key start
LH: loop header
LB: loop body
LE: loop exit
PB: predicated region body
PF: predicated region fallthrough
CT: control target
= control target key end

     0   :  { %s713_s15 = smov 0   ;;  %s715_s16 = smov 0   ;;  %s774_s0 = inlined_call_operand.vmem [shape: bf16[2,18,4], index: 0, kind: input, shape index: {}]   ;;  %s775_s1 = inlined_call_operand.vmem [shape: bf16[3,4,128], index: 1, kind: input, shape index: {}]   ;;  %s776_s2 = inlined_call_operand.vmem [shape: f32[1,128], index: 2, kind: input, shape index: {}]   ;;  %s777_s3 = inlined_call_operand.vmem [shape: f32[1,128], index: 3, kind: input, shape index: {}]   ;;  %s778_s4 = inlined_call_operand.vmem [shape: f32[2,16,128], index: 4, kind: output, shape index: {}]  }
   0x1   :  { %s717_s17 = smov 0  }
   0x2 LB: > { %s26_s18 = sadd.s32 1, %s680_s16  ;;  %p587_p0 = scmp.ge.s32.totalorder %s684_s17, 1  ;;  %s684_s17 = sphi %s717_s17, %s14_s17   ;;  %s680_s16 = sphi %s715_s16, %s780_s16   ;;  %s676_s15 = sphi %s713_s15, %s779_s15  }
   0x3   : > { %p28_p1 = scmp.ge.s32.totalorder %s26_s18, 2  ;;  %p201_p2 = scmp.lt.s32.totalorder %s684_s17, 3 }
   0x5   : > { %s782_s18 = smov (%p28_p1, %s26_s18), 0  ;;  %p202_p3 = pnand %p587_p0, %p201_p2 }
   0x6   : > { %v267_v0 = vld [vmem:[%s775_s1] sm:$0x3] (!%p202_p3)  ;;  %vm295_vm0 = vcmask (!%p202_p3), 1041408   ;;  %p240_p4 = scmp.lt.s32.totalorder (!%p202_p3), %s676_s15, 1  ;;  %v686_v1 = vmov (!%p202_p3), 0.0   ;;  %vm687_vm1 = vmmov (!%p202_p3), 0  }
   0x7   : > { %205 = sbr.rel (%p202_p3) target bundleno = 254 (0xfe), region = 36  ;;  %615 = vmatprep.subr.bf16.mxu0 (!%p202_p3), %v686_v1  ;;  %v343_v2 = vsel (!%p202_p3), %vm295_vm0, %v267_v0, 0  ;;  %617 = vmatprep.mubr.msk.bf16.mxu0 (!%p202_p3), %vm687_vm1, %v686_v1  ;;  %v591_v3 = vld [vmem:[%s775_s1 + $0x2] sm:$0x3] (!%p202_p3)  ;;  %v596_v5 = vld [vmem:[%s775_s1 + $0x4] sm:$0x3] (!%p202_p3) }
   0x8   : > { %616 = vmatpush3.bf16.msra.mxu0 (!%p202_p3), %v343_v2  ;;  %609 = vmatprep.subr.bf16.mxu1 (!%p202_p3), %v686_v1  ;;  %v297_v4 = vsel (!%p202_p3), %vm295_vm0, %v591_v3, 0  ;;  %vm291_vm2 = vcmask (!%p202_p3), 31744   ;;  %v396_v7 = vsel (!%p202_p3), %vm295_vm0, %v596_v5, 0  ;;  %vm278_vm3 = vsmask.f32 (!%p202_p3), 7424 }
   0x9   : > { %621 = vmatprep.subr.bf16.mxu0 (!%p202_p3), %v686_v1  ;;  %610 = vmatpush3.bf16.msra.mxu1 (!%p202_p3), %v297_v4  ;;  %vm388_vm4 = vcmask (!%p202_p3), 1046528   ;;  %v598_v24 = vld [vmem:[%s776_s2] ss:$0 sm:$0xff] (!%p202_p3) }
   0xa   : > { %611 = vmatprep.mubr.msk.bf16.mxu1 (!%p202_p3), %vm687_vm1, %v686_v1  ;;  %v599_v27 = vld [vmem:[%s777_s3] ss:$0 sm:$0xff] (!%p202_p3) }
   0xe   : > { %s784_s15 = smov (!%p240_p4, %s676_s15), 1 }
   0xf   : > { %s633_s23 = smul.u32 12, %s784_s15  ;;  %s602_s7 = sshll.u32 %s784_s15, 4 }
  0x10   : > { %s262_s10 = scalar_lea.vmem %s778_s4, %s602_s7 }
  0x11   : > { %s244_s28 = scalar_lea.vmem %s774_s0, %s633_s23 }
  0x12   : > { %v660_v6 = vld [vmem:[%s244_s28] sm:$0xff]   ;;  %v661_v8 = vld [vmem:[%s244_s28 + $0x8] ss:$0 sps:$4 sm:$0x11]  }
  0x13   : > { %618 = vmatmul.mubr.msk.bf16.vlgmr.msra.gmra.mrb[0].mxu0 %vm291_vm2, %v660_v6  ;;  %v280_v9 = vshrl.u32 %v660_v6, 16  ;;  %v282_v10 = vshll.u32 %v660_v6, 16  ;;  %v287_v11 = vshll.u32 %v661_v8, 16  ;;  %v389_v15 = vrot.slane %v660_v6, 1 }
  0x14   : > { %622 = vmatpush3.bf16.msra.mxu0 %v396_v7  ;;  %623 = vmatprep.mubr.msk.bf16.mxu0 %vm687_vm1, %v686_v1  ;;  %v390_v16 = vrot.slane %v661_v8, 1 }
  0x15   : > { %v284_v12 = vrot.slane %v282_v10, 1  ;;  %v289_v13 = vrot.slane %v287_v11, 1 }
  0x16   : > { %v391_v18 = vsel %vm388_vm4, %v389_v15, %v390_v16 }
  0x17   : > { %v285_v14 = vor.u32 %v284_v12, %v280_v9 }
  0x19   : > { %v290_v17 = vsel %vm278_vm3, %v285_v14, %v289_v13 }
  0x1a   : > { %612 = vmatmul.mubr.msk.bf16.vlgmr.msra.gmra.mrb[0].mxu1 %vm291_vm2, %v290_v17 }
  0x1f   : > { %624 = vmatmul.mubr.msk.bf16.vlgmr.msra.gmra.mrb[0].mxu0 %vm291_vm2, %v391_v18 }
  0xed   : > { %v333_v19 = vpop.f32.mrb[0].mxu1 }
  0xee   : > { %v613_v20 = vpop.f32.mrb[1].mxu1 }
  0xef   : > { %v336_v21 = vpop.f32.mrb[2].mxu1 }
  0xf0   : > { %v614_v22 = vpop.f32.mrb[3].mxu1 }
  0xf2   : > { %v432_v23 = vpop.f32.mrb[0].mxu0 }
  0xf3   : > { %v627_v25 = vadd.f32 %v432_v23, %v333_v19  ;;  %v625_v26 = vpop.f32.mrb[1].mxu0 }
  0xf4   : > { %v435_v28 = vpop.f32.mrb[2].mxu0 }
  0xf5   : > { %v448_v29 = vmul.f32 %v627_v25, %v598_v24  ;;  %v628_v30 = vadd.f32 %v435_v28, %v336_v21  ;;  %v626_v31 = vpop.f32.mrb[3].mxu0 }
  0xf7   : > { %v457_v32 = vadd.f32 %v599_v27, %v448_v29  ;;  %v449_v33 = vmul.f32 %v628_v30, %v598_v24 }
  0xf9   : > { %v459_v34 = vmax.f32 %v457_v32, 0.0  ;;  %v458_v35 = vadd.f32 %v599_v27, %v449_v33 }
  0xfb   : > { %461 = vst [vmem:[%s262_s10] sm:$0xff] %v459_v34  ;;  %v460_v36 = vmax.f32 %v458_v35, 0.0 }
  0xfd   : > { %462 = vst [vmem:[%s262_s10 + $0x8] sm:$0xff] %v460_v36 }
  0xfe PF: > { %s14_s17 = sadd.s32 1, %s684_s17   ;;  %s779_s15 = smov %s680_s16 }
  0xff   : > { %p11_p5 = scmp.ge.s32.totalorder %s14_s17, 4   ;;  %s780_s16 = smov %s782_s18 }
 0x101   :  { %13 = sbr.rel (!%p11_p5) target bundleno = 2 (0x2), region = 77 }

</bundles_post_ra>
